<compile_context>
chip_gen: v7x
topology: tpu7x:2x2x1
jax: 0.10.0
libtpu: 0.0.40
codegen_flags: <defaults>
</compile_context>

<pallas_src>
import jax
import jax.numpy as jnp
from jax.experimental import pallas as pl
from jax.experimental.pallas import tpu as pltpu


def _geo_embed_kernel(x_ref, w_ref, b_ref, o_ref):
    # x_ref: [tm, K]   (K = 3, or 3*r for the lane-packed path)
    # w_ref: [K, tn]   (W.T, possibly block-diagonal replicated)
    # b_ref: [1, tn]
    # o_ref: [tm, tn]
    x = x_ref[...].astype(jnp.float32)
    w = w_ref[...].astype(jnp.float32)
    k = x.shape[1]
    # K is tiny (3..12): unrolled broadcast multiply-adds on the VPU; f32
    # accumulation, cast only on the final store.
    acc = x[:, 0:1] * w[0:1, :]
    for q in range(1, k):
        acc = acc + x[:, q:q + 1] * w[q:q + 1, :]
    o_ref[...] = (acc + b_ref[...].astype(jnp.float32)).astype(o_ref.dtype)


def _vmem_capacity_bytes():
    """Physical VMEM per core; conservative (v7x) fallback if query fails."""
    try:
        info = pltpu.get_tpu_info()
        cap = int(getattr(info, "vmem_capacity_bytes", 0))
        if cap > 0:
            return cap
    except Exception:
        pass
    return 64 * 1024 * 1024


def geo_positional_embedding(x, weight, bias, *, tm=4096, tn_max=1024,
                             out_dtype=None, out_buffers=2,
                             min_pallas_out_elems=1 << 20,
                             force_pallas=False):
    """y = x @ weight.T + bias via a Pallas TPU kernel.

    x:      [..., 3]
    weight: [d_model, 3]   (PyTorch nn.Linear layout)
    bias:   [d_model]
    out_dtype: output dtype (defaults to x.dtype); f32 accumulation in-kernel.
    returns [..., d_model]
    """
    d_model = weight.shape[0]
    orig_shape = x.shape
    assert orig_shape[-1] == 3, "GeoPositionalEmbedding expects last dim == 3"
    if out_dtype is None:
        out_dtype = x.dtype

    x2d = x.reshape(-1, 3)
    M = x2d.shape[0]

    # ---- degenerate / tiny-problem paths ------------------------------------
    if M == 0:
        return jnp.zeros((*orig_shape[:-1], d_model), out_dtype)
    if not force_pallas and M * d_model < min_pallas_out_elems:
        # Small problem: Pallas dispatch + pipeline prologue dominates; XLA
        # fuses this trivially.
        y = (x2d.astype(jnp.float32) @ weight.T.astype(jnp.float32)
             + bias.astype(jnp.float32)).astype(out_dtype)
        return y.reshape(*orig_shape[:-1], d_model)

    w_t = weight.T  # [3, d_model]

    # ---- lane-dense packing --------------------------------------------------
    # When d_model < 128 and divides 128, pack r = 128 // d_model tokens per
    # row so output rows are 128-lane dense (unmasked vst).  Never drop this
    # path: pad M up to a multiple of r with zero rows and slice afterwards.
    r = 1
    if d_model < 128 and 128 % d_model == 0:
        r = 128 // d_model

    M_pad = ((M + r - 1) // r) * r
    if M_pad != M:
        x2d = jnp.pad(x2d, ((0, M_pad - M), (0, 0)))

    if r > 1:
        # NOTE: these constant transforms (kron / tile / transpose) are tiny and
        # constant-fold under jit; hoist per-model if called un-jitted per step.
        x_in = x2d.reshape(M_pad // r, 3 * r)                   # [M_pad/r, 3r]
        w_in = jnp.kron(jnp.eye(r, dtype=w_t.dtype), w_t)       # [3r, r*d_model]
        b_in = jnp.tile(bias, r).reshape(1, r * d_model)        # [1, r*d_model]
    else:
        x_in = x2d
        w_in = w_t
        b_in = bias.reshape(1, d_model)

    Mr, K = x_in.shape
    N = w_in.shape[1]
    out_item = jnp.dtype(out_dtype).itemsize

    # ---- N tiling -------------------------------------------------------------
    # Tile N only when it is large and 128-divisible; every block is then a
    # multiple of 128 lanes or the full extent (always a legal TPU BlockSpec).
    if N > tn_max and N % 128 == 0:
        tn = tn_max
        while N % tn != 0:
            tn -= 128
        grid_n = N // tn
    else:
        tn = N
        grid_n = 1

    # ---- M (row) tiling --------------------------------------------------------
    vmem_cap = _vmem_capacity_bytes()
    # Per-row VMEM footprint, double-buffered:
    #   x tile  : K <= 128 lanes still occupies a full 128-lane row (f32 compute)
    #   out tile: tn lanes (>=128 on the packed path) at out_item bytes
    row_bytes = 2 * (128 * 4 + max(tn, 128) * max(out_item, 4))
    budget = vmem_cap // 3  # leave room for weights/bias/extra buffering/headroom

    tm_cap = tm
    while tm_cap > 512 and tm_cap * row_bytes > budget:
        tm_cap //= 2

    tm_eff = min(tm_cap, Mr)
    # Keep >= ~4 grid steps along m when there is enough work so v7x's two
    # TensorCores both get blocks (axis is "parallel"); no effect on v5e/v6e.
    if Mr >= 2048:
        quarter = ((pl.cdiv(Mr, 4) + 7) // 8) * 8
        tm_eff = min(tm_eff, quarter)
    if tm_eff < Mr:
        tm_eff = max(8, (tm_eff // 8) * 8)   # sublane-aligned when tiling

    grid_m = pl.cdiv(Mr, tm_eff)             # partial last block clipped by Pallas

    vmem_limit = max(32 * 1024 * 1024, min(vmem_cap * 3 // 4, 96 * 1024 * 1024))

    cost = pl.CostEstimate(
        flops=2 * M * 3 * d_model + M * d_model,
        transcendentals=0,
        bytes_accessed=(x_in.size * x_in.dtype.itemsize
                        + w_in.size * w_in.dtype.itemsize
                        + b_in.size * b_in.dtype.itemsize
                        + Mr * N * out_item),
    )

    # Optional deeper output pipelining (only if a trace shows exposed writeback).
    if out_buffers and out_buffers > 2:
        x_spec = pl.BlockSpec((tm_eff, K), lambda i, j: (i, 0),
                              pipeline_mode=pl.Buffered(out_buffers))
        out_spec = pl.BlockSpec((tm_eff, tn), lambda i, j: (i, j),
                                pipeline_mode=pl.Buffered(out_buffers))
    else:
        x_spec = pl.BlockSpec((tm_eff, K), lambda i, j: (i, 0))
        out_spec = pl.BlockSpec((tm_eff, tn), lambda i, j: (i, j))

    out = pl.pallas_call(
        _geo_embed_kernel,
        out_shape=jax.ShapeDtypeStruct((Mr, N), out_dtype),
        grid_spec=pltpu.PrefetchScalarGridSpec(
            num_scalar_prefetch=0,
            grid=(grid_m, grid_n),
            in_specs=[
                x_spec,
                pl.BlockSpec((K, tn), lambda i, j: (0, j)),
                pl.BlockSpec((1, tn), lambda i, j: (0, j)),
            ],
            out_specs=out_spec,
        ),
        compiler_params=pltpu.CompilerParams(
            dimension_semantics=("parallel", "parallel"),
            vmem_limit_bytes=vmem_limit,
        ),
        cost_estimate=cost,
    )(x_in, w_in, b_in)

    # Row-major reshape back to token-major layout; drop the r-alignment pad rows.
    y2d = out.reshape(M_pad, d_model)
    if M_pad != M:
        y2d = y2d[:M]
    return y2d.reshape(*orig_shape[:-1], d_model)


if __name__ == "__main__":
    key = jax.random.PRNGKey(0)
    k_x, k_w, k_b, k_x2 = jax.random.split(key, 4)

    d_model = 32

    # Deterministic parameter init mimicking nn.Linear(3, d_model):
    # U(-1/sqrt(in_features), 1/sqrt(in_features)) with in_features = 3.
    bound = 1.0 / jnp.sqrt(3.0)
    weight = jax.random.uniform(k_w, (d_model, 3), jnp.float32, -bound, bound)
    bias = jax.random.uniform(k_b, (d_model,), jnp.float32, -bound, bound)

    # 1) Module-sized input [B, S, 3] (tiny; force the Pallas path so the
    #    kernel itself is exercised rather than the XLA small-problem fallback).
    B, S = 2, 8
    x = jax.random.normal(k_x, (B, S, 3), jnp.float32)
    y = jax.block_until_ready(
        geo_positional_embedding(x, weight, bias, force_pallas=True))
    y_ref = x @ weight.T + bias
    assert y.shape == (B, S, d_model)
    assert jnp.allclose(y, y_ref, atol=1e-5, rtol=1e-5)

    # 2) Token count not a multiple of r = 128 // d_model: exercises the
    #    zero-pad for lane-dense packing, a multi-step m grid and a partial
    #    edge block.
    M2 = 10_003
    x2 = jax.random.normal(k_x2, (M2, 3), jnp.float32)
    y2 = jax.block_until_ready(
        geo_positional_embedding(x2, weight, bias, force_pallas=True))
    y2_ref = x2 @ weight.T + bias
    assert y2.shape == (M2, d_model)
    assert jnp.allclose(y2, y2_ref, atol=1e-5, rtol=1e-5)

    print("KERNEL_OK")
</pallas_src>

<mosaic_0001>
module attributes {stable_mosaic.version = 11 : i64} {
  func.func @_geo_embed_kernel(%arg0: i32, %arg1: i32, %arg2: memref<4x12xf32, #tpu.memory_space<vmem>>, %arg3: memref<12x128xf32, #tpu.memory_space<vmem>>, %arg4: memref<1x128xf32, #tpu.memory_space<vmem>>, %arg5: memref<4x128xf32, #tpu.memory_space<vmem>>) attributes {dimension_semantics = [#tpu.dimension_semantics<parallel>, #tpu.dimension_semantics<parallel>], iteration_bounds = array<i64: 1, 1>, scalar_prefetch = 0 : i64, scratch_operands = 0 : i64, tpu.core_type = #tpu.core_type<tc>, window_params = [{transform_indices = @transform_0, window_bounds = array<i64: 4, 12>}, {transform_indices = @transform_1, window_bounds = array<i64: 12, 128>}, {transform_indices = @transform_2, window_bounds = array<i64: 1, 128>}, {transform_indices = @transform_3, window_bounds = array<i64: 4, 128>}]} {
    %c0 = arith.constant 0 : index
    %c0_0 = arith.constant 0 : index
    %0 = vector.load %arg2[%c0, %c0_0] : memref<4x12xf32, #tpu.memory_space<vmem>>, vector<4x12xf32>
    %c0_1 = arith.constant 0 : index
    %c0_2 = arith.constant 0 : index
    %1 = vector.load %arg3[%c0_1, %c0_2] : memref<12x128xf32, #tpu.memory_space<vmem>>, vector<12x128xf32>
    %2 = vector.extract_strided_slice %0 {offsets = [0, 0], sizes = [4, 1], strides = [1, 1]} : vector<4x12xf32> to vector<4x1xf32>
    %3 = vector.extract_strided_slice %1 {offsets = [0, 0], sizes = [1, 128], strides = [1, 1]} : vector<12x128xf32> to vector<1x128xf32>
    %4 = vector.broadcast %2 : vector<4x1xf32> to vector<4x128xf32>
    %5 = vector.broadcast %3 : vector<1x128xf32> to vector<4x128xf32>
    %6 = arith.mulf %4, %5 : vector<4x128xf32>
    %7 = vector.extract_strided_slice %0 {offsets = [0, 1], sizes = [4, 1], strides = [1, 1]} : vector<4x12xf32> to vector<4x1xf32>
    %8 = vector.extract_strided_slice %1 {offsets = [1, 0], sizes = [1, 128], strides = [1, 1]} : vector<12x128xf32> to vector<1x128xf32>
    %9 = vector.broadcast %7 : vector<4x1xf32> to vector<4x128xf32>
    %10 = vector.broadcast %8 : vector<1x128xf32> to vector<4x128xf32>
    %11 = arith.mulf %9, %10 : vector<4x128xf32>
    %12 = arith.addf %6, %11 : vector<4x128xf32>
    %13 = vector.extract_strided_slice %0 {offsets = [0, 2], sizes = [4, 1], strides = [1, 1]} : vector<4x12xf32> to vector<4x1xf32>
    %14 = vector.extract_strided_slice %1 {offsets = [2, 0], sizes = [1, 128], strides = [1, 1]} : vector<12x128xf32> to vector<1x128xf32>
    %15 = vector.broadcast %13 : vector<4x1xf32> to vector<4x128xf32>
    %16 = vector.broadcast %14 : vector<1x128xf32> to vector<4x128xf32>
    %17 = arith.mulf %15, %16 : vector<4x128xf32>
    %18 = arith.addf %12, %17 : vector<4x128xf32>
    %19 = vector.extract_strided_slice %0 {offsets = [0, 3], sizes = [4, 1], strides = [1, 1]} : vector<4x12xf32> to vector<4x1xf32>
    %20 = vector.extract_strided_slice %1 {offsets = [3, 0], sizes = [1, 128], strides = [1, 1]} : vector<12x128xf32> to vector<1x128xf32>
    %21 = vector.broadcast %19 : vector<4x1xf32> to vector<4x128xf32>
    %22 = vector.broadcast %20 : vector<1x128xf32> to vector<4x128xf32>
    %23 = arith.mulf %21, %22 : vector<4x128xf32>
    %24 = arith.addf %18, %23 : vector<4x128xf32>
    %25 = vector.extract_strided_slice %0 {offsets = [0, 4], sizes = [4, 1], strides = [1, 1]} : vector<4x12xf32> to vector<4x1xf32>
    %26 = vector.extract_strided_slice %1 {offsets = [4, 0], sizes = [1, 128], strides = [1, 1]} : vector<12x128xf32> to vector<1x128xf32>
    %27 = vector.broadcast %25 : vector<4x1xf32> to vector<4x128xf32>
    %28 = vector.broadcast %26 : vector<1x128xf32> to vector<4x128xf32>
    %29 = arith.mulf %27, %28 : vector<4x128xf32>
    %30 = arith.addf %24, %29 : vector<4x128xf32>
    %31 = vector.extract_strided_slice %0 {offsets = [0, 5], sizes = [4, 1], strides = [1, 1]} : vector<4x12xf32> to vector<4x1xf32>
    %32 = vector.extract_strided_slice %1 {offsets = [5, 0], sizes = [1, 128], strides = [1, 1]} : vector<12x128xf32> to vector<1x128xf32>
    %33 = vector.broadcast %31 : vector<4x1xf32> to vector<4x128xf32>
    %34 = vector.broadcast %32 : vector<1x128xf32> to vector<4x128xf32>
    %35 = arith.mulf %33, %34 : vector<4x128xf32>
    %36 = arith.addf %30, %35 : vector<4x128xf32>
    %37 = vector.extract_strided_slice %0 {offsets = [0, 6], sizes = [4, 1], strides = [1, 1]} : vector<4x12xf32> to vector<4x1xf32>
    %38 = vector.extract_strided_slice %1 {offsets = [6, 0], sizes = [1, 128], strides = [1, 1]} : vector<12x128xf32> to vector<1x128xf32>
    %39 = vector.broadcast %37 : vector<4x1xf32> to vector<4x128xf32>
    %40 = vector.broadcast %38 : vector<1x128xf32> to vector<4x128xf32>
    %41 = arith.mulf %39, %40 : vector<4x128xf32>
    %42 = arith.addf %36, %41 : vector<4x128xf32>
    %43 = vector.extract_strided_slice %0 {offsets = [0, 7], sizes = [4, 1], strides = [1, 1]} : vector<4x12xf32> to vector<4x1xf32>
    %44 = vector.extract_strided_slice %1 {offsets = [7, 0], sizes = [1, 128], strides = [1, 1]} : vector<12x128xf32> to vector<1x128xf32>
    %45 = vector.broadcast %43 : vector<4x1xf32> to vector<4x128xf32>
    %46 = vector.broadcast %44 : vector<1x128xf32> to vector<4x128xf32>
    %47 = arith.mulf %45, %46 : vector<4x128xf32>
    %48 = arith.addf %42, %47 : vector<4x128xf32>
    %49 = vector.extract_strided_slice %0 {offsets = [0, 8], sizes = [4, 1], strides = [1, 1]} : vector<4x12xf32> to vector<4x1xf32>
    %50 = vector.extract_strided_slice %1 {offsets = [8, 0], sizes = [1, 128], strides = [1, 1]} : vector<12x128xf32> to vector<1x128xf32>
    %51 = vector.broadcast %49 : vector<4x1xf32> to vector<4x128xf32>
    %52 = vector.broadcast %50 : vector<1x128xf32> to vector<4x128xf32>
    %53 = arith.mulf %51, %52 : vector<4x128xf32>
    %54 = arith.addf %48, %53 : vector<4x128xf32>
    %55 = vector.extract_strided_slice %0 {offsets = [0, 9], sizes = [4, 1], strides = [1, 1]} : vector<4x12xf32> to vector<4x1xf32>
    %56 = vector.extract_strided_slice %1 {offsets = [9, 0], sizes = [1, 128], strides = [1, 1]} : vector<12x128xf32> to vector<1x128xf32>
    %57 = vector.broadcast %55 : vector<4x1xf32> to vector<4x128xf32>
    %58 = vector.broadcast %56 : vector<1x128xf32> to vector<4x128xf32>
    %59 = arith.mulf %57, %58 : vector<4x128xf32>
    %60 = arith.addf %54, %59 : vector<4x128xf32>
    %61 = vector.extract_strided_slice %0 {offsets = [0, 10], sizes = [4, 1], strides = [1, 1]} : vector<4x12xf32> to vector<4x1xf32>
    %62 = vector.extract_strided_slice %1 {offsets = [10, 0], sizes = [1, 128], strides = [1, 1]} : vector<12x128xf32> to vector<1x128xf32>
    %63 = vector.broadcast %61 : vector<4x1xf32> to vector<4x128xf32>
    %64 = vector.broadcast %62 : vector<1x128xf32> to vector<4x128xf32>
    %65 = arith.mulf %63, %64 : vector<4x128xf32>
    %66 = arith.addf %60, %65 : vector<4x128xf32>
    %67 = vector.extract_strided_slice %0 {offsets = [0, 11], sizes = [4, 1], strides = [1, 1]} : vector<4x12xf32> to vector<4x1xf32>
    %68 = vector.extract_strided_slice %1 {offsets = [11, 0], sizes = [1, 128], strides = [1, 1]} : vector<12x128xf32> to vector<1x128xf32>
    %69 = vector.broadcast %67 : vector<4x1xf32> to vector<4x128xf32>
    %70 = vector.broadcast %68 : vector<1x128xf32> to vector<4x128xf32>
    %71 = arith.mulf %69, %70 : vector<4x128xf32>
    %72 = arith.addf %66, %71 : vector<4x128xf32>
    %c0_3 = arith.constant 0 : index
    %c0_4 = arith.constant 0 : index
    %73 = vector.load %arg4[%c0_3, %c0_4] : memref<1x128xf32, #tpu.memory_space<vmem>>, vector<1x128xf32>
    %74 = vector.broadcast %73 : vector<1x128xf32> to vector<4x128xf32>
    %75 = arith.addf %72, %74 : vector<4x128xf32>
    %c0_5 = arith.constant 0 : index
    %c0_6 = arith.constant 0 : index
    %76 = vector.load %arg5[%c0_5, %c0_6] : memref<4x128xf32, #tpu.memory_space<vmem>>, vector<4x128xf32>
    tpu.vector_store %arg5[%c0_5, %c0_6], %75 {strides = array<i32>} : memref<4x128xf32, #tpu.memory_space<vmem>>, vector<4x128xf32>,
    return
  }
  func.func @transform_0(%arg0: i32, %arg1: i32) -> (i32, i32) {
    %c0_i32 = arith.constant 0 : i32
    %c0_i32_0 = arith.constant 0 : i32
    return %arg0, %c0_i32 : i32, i32
  }
  func.func @transform_1(%arg0: i32, %arg1: i32) -> (i32, i32) {
    %c0_i32 = arith.constant 0 : i32
    %c0_i32_0 = arith.constant 0 : i32
    return %c0_i32, %arg1 : i32, i32
  }
  func.func @transform_2(%arg0: i32, %arg1: i32) -> (i32, i32) {
    %c0_i32 = arith.constant 0 : i32
    %c0_i32_0 = arith.constant 0 : i32
    return %c0_i32, %arg1 : i32, i32
  }
  func.func @transform_3(%arg0: i32, %arg1: i32) -> (i32, i32) {
    %c0_i32 = arith.constant 0 : i32
    return %arg0, %arg1 : i32, i32
  }
}

</mosaic_0001>

<bundles_post_ra>
// kernel: tpu_custom_call.1
= control target key start
LH: loop header
LB: loop body
LE: loop exit
PB: predicated region body
PF: predicated region fallthrough
CT: control target
= control target key end

     0   :  { %8 = vsyncpa [#allocation3], 0  ;;  %s374_s0 = inlined_call_operand.hbm [shape: f32[4,12], index: 0, kind: input, shape index: {}]   ;;  %s375_s1 = inlined_call_operand.hbm [shape: f32[12,128], index: 1, kind: input, shape index: {}]   ;;  %s376_s2 = inlined_call_operand.vmem [shape: f32[1,128], index: 2, kind: input, shape index: {}]   ;;  %s377_s3 = inlined_call_operand.hbm [shape: f32[4,128], index: 3, kind: output, shape index: {}]  }
   0x1   :  { %9 = vsyncpa [#allocation6], 0 }
   0x2   :  { %10 = vsyncpa [#allocation4], 0  ;;  %s291_s12 = smov [#allocation2]   ;;  %s292_s14 = smov [#allocation5]  }
   0x3   :  { %s17_s13 = sshll.u32 %s291_s12, 4  ;;  %s26_s15 = sshll.u32 %s292_s14, 4  ;;  %s18_s13 = int_to_ptr.vmem [resolvable:$true] %s17_s13  ;;  %s328_s15 = int_to_ptr.vmem [resolvable:$true] %s26_s15 }
   0x4   :  { %s219_s18 = scalar_lea.hbm %s374_s0, 64 }
   0x5   :  { %p220_p0 = scmp.ne.s32.totalorder %s374_s0, %s219_s18  ;;  %p223_p1 = scmp.lt.u32.totalorder %s219_s18, %s374_s0 }
   0x7   :  { %p225_p2 = pnand %p223_p1, %p220_p0 }
   0x9   :  { %228 = shalt.err (!%p225_p2)
}
   0xa   :  { %s229_s23 = scalar_lea.vmem %s18_s13, 64  ;;  %p234_p4 = scmp.lt.s32.totalorder %s18_s13, %s18_s13 }
   0xb   :  { %p230_p3 = scmp.ne.s32.totalorder %s18_s13, %s229_s23  ;;  %p235_p5 = scmp.lt.s32.totalorder %s229_s23, %s229_s23 }
   0xd   :  { %p236_p6 = por %p235_p5, %p234_p4 }
   0xf   :  { %p237_p7 = pnand %p236_p6, %p230_p3 }
  0x11   :  { %240 = shalt.err (!%p237_p7)
}
  0x12   :  { %20 = dma.hbm_to_vmem [thread:$0]  %s374_s0, 64, %s18_s13, [#allocation3]  }
  0x13   :  { %s241_s28 = scalar_lea.hbm %s375_s1, 256 }
  0x14   :  { %p242_p8 = scmp.ne.s32.totalorder %s375_s1, %s241_s28  ;;  %p245_p9 = scmp.lt.u32.totalorder %s241_s28, %s375_s1 }
  0x16   :  { %p247_p10 = pnand %p245_p9, %p242_p8 }
  0x18   :  { %250 = shalt.err (!%p247_p10)
}
  0x19   :  { %s251_s6 = scalar_lea.vmem %s328_s15, 256  ;;  %p256_p12 = scmp.lt.s32.totalorder %s328_s15, %s328_s15 }
  0x1a   :  { %p252_p11 = scmp.ne.s32.totalorder %s328_s15, %s251_s6  ;;  %p257_p13 = scmp.lt.s32.totalorder %s251_s6, %s251_s6 }
  0x1c   :  { %p258_p0 = por %p257_p13, %p256_p12 }
  0x1e   :  { %p259_p1 = pnand %p258_p0, %p252_p11 }
  0x20   :  { %262 = shalt.err (!%p259_p1)
}
  0x21   :  { %s293_s0 = smov 128   ;;  %s294_s7 = smov 8  }
  0x22   :  { %32 = dma.hbm_to_vmem [thread:$0]  %s375_s1, 256, %s328_s15, [#allocation6], %s293_s0, %s293_s0, %s294_s7  }
  0x23   :  { %285 = dma.done.wait [#allocation3], 64  }
  0x24   :  { %286 = vsyncadd [#allocation3], 4294967232 }
  0x25   :  { %287 = dma.done.wait [#allocation6], 256  }
  0x26   :  { %288 = vsyncadd [#allocation6], 4294967040  ;;  %v295_v0 = vmov 2   ;;  %v296_v1 = vmov 0   ;;  %v41_v2 = vld [vmem:[#allocation2] sm:$0xf]  ;;  %v49_v13 = vlaneseq }
  0x27   :  { %209 = vset.pattern.permute.xlu1 %v295_v0  ;;  %207 = vset.pattern.permute.xlu0 %v296_v1  ;;  %v297_v3 = vmov 3   ;;  %v298_v4 = vmov 1   ;;  %v299_v5 = vmov 4   ;;  %v300_v6 = vmov 5   ;;  %v42_v17 = vld [vmem:[#allocation5] sm:$0xff]  ;;  %s307_s11 = smov [#allocation7]  }
  0x28   :  { %65 = vperm.xlu1 %209, %v41_v2   ;;  %46 = vperm.xlu0 %207, %v41_v2   ;;  %v301_v7 = vmov 6   ;;  %v302_v8 = vmov 8   ;;  %v303_v9 = vmov 7   ;;  %v304_v10 = vmov 11   ;;  %v43_v48 = vld [vmem:[#allocation5 + $0x8] sm:$0xf] }
  0x29   :  { %v305_v11 = vmov 9   ;;  %v306_v12 = vmov 10   ;;  %v50_v14 = vshrl.u32 %v49_v13, 7  ;;  %s179_s12 = sshll.u32 %s307_s11, 4  ;;  %s180_s12 = int_to_ptr.vmem [resolvable:$true] %s179_s12 }
  0x2a   :  { %s263_s13 = scalar_lea.vmem %s180_s12, 64  ;;  %p268_p3 = scmp.lt.s32.totalorder %s180_s12, %s180_s12 }
  0x2b   :  { %v51_v15 = vsub.s32 0, %v50_v14  ;;  %v60_v16 = vsub.s32 1, %v50_v14  ;;  %v70_v18 = vsub.s32 2, %v50_v14  ;;  %v80_v22 = vsub.s32 3, %v50_v14  ;;  %p264_p2 = scmp.ne.s32.totalorder %s180_s12, %s263_s13  ;;  %p269_p4 = scmp.lt.s32.totalorder %s263_s13, %s263_s13 }
  0x2c   :  { %210 = vset.pattern.permute.xlu1 %v297_v3  ;;  %208 = vset.pattern.permute.xlu0 %v298_v4  ;;  %v90_v24 = vsub.s32 4, %v50_v14  ;;  %v100_v29 = vsub.s32 5, %v50_v14  ;;  %v110_v36 = vsub.s32 6, %v50_v14  ;;  %v120_v45 = vsub.s32 7, %v50_v14 }
  0x2d   :  { %75 = vperm.xlu1 %210, %v41_v2   ;;  %55 = vperm.xlu0 %208, %v41_v2   ;;  %v52_v20 = vrot.slane %v42_v17, %v51_v15  ;;  %v61_v23 = vrot.slane %v42_v17, %v60_v16  ;;  %v71_v25 = vrot.slane %v42_v17, %v70_v18  ;;  %p270_p5 = por %p269_p4, %p268_p3 }
  0x2e   :  { %v81_v30 = vrot.slane %v42_v17, %v80_v22  ;;  %v91_v32 = vrot.slane %v42_v17, %v90_v24  ;;  %v101_v35 = vrot.slane %v42_v17, %v100_v29  ;;  %v111_v44 = vrot.slane %v42_v17, %v110_v36 }
  0x2f   :  { %v121_v51 = vrot.slane %v42_v17, %v120_v45  ;;  %v131_v52 = vrot.slane %v43_v48, %v51_v15  ;;  %v141_v59 = vrot.slane %v43_v48, %v60_v16  ;;  %v151_v63 = vrot.slane %v43_v48, %v70_v18  ;;  %p271_p6 = pnand %p270_p5, %p264_p2 }
  0x30   :  { %v161_v0 = vrot.slane %v43_v48, %v80_v22 }
  0x31   :  { %211 = vset.pattern.permute.xlu1 %v299_v5  ;;  %212 = vset.pattern.permute.xlu0 %v300_v6 }
  0x32   :  { %85 = vperm.xlu1 %211, %v41_v2   ;;  %95 = vperm.xlu0 %212, %v41_v2  }
  0x36   :  { %213 = vset.pattern.permute.xlu1 %v301_v7  ;;  %215 = vset.pattern.permute.xlu0 %v302_v8  ;;  %v189_v7 = vld [vmem:[%s376_s2] ss:$0 sm:$0xff] }
  0x37   :  { %105 = vperm.xlu1 %213, %v41_v2   ;;  %125 = vperm.xlu0 %215, %v41_v2  }
  0x3b   :  { %214 = vset.pattern.permute.xlu1 %v303_v9  ;;  %218 = vset.pattern.permute.xlu0 %v304_v10 }
  0x3c   :  { %115 = vperm.xlu1 %214, %v41_v2   ;;  %155 = vperm.xlu0 %218, %v41_v2  }
  0x40   :  { %216 = vset.pattern.permute.xlu1 %v305_v11 }
  0x41   :  { %135 = vperm.xlu1 %216, %v41_v2  }
  0x45   :  { %217 = vset.pattern.permute.xlu1 %v306_v12 }
  0x46   :  { %145 = vperm.xlu1 %217, %v41_v2  }
  0xa7   :  { %v66_v19 = vpop.permute.xlu1 %65  ;;  %v47_v21 = vpop.permute.xlu0 %46 }
  0xa8   :  { %v53_v26 = vmul.f32 %v52_v20, %v47_v21  ;;  %v72_v33 = vmul.f32 %v71_v25, %v66_v19 }
  0xac   :  { %v76_v27 = vpop.permute.xlu1 %75  ;;  %v56_v28 = vpop.permute.xlu0 %55 }
  0xad   :  { %v62_v31 = vmul.f32 %v61_v23, %v56_v28  ;;  %v82_v37 = vmul.f32 %v81_v30, %v76_v27 }
  0xaf   :  { %v63_v34 = vadd.f32 %v62_v31, %v53_v26 }
  0xb1   :  { %v73_v38 = vadd.f32 %v72_v33, %v63_v34  ;;  %v86_v39 = vpop.permute.xlu1 %85  ;;  %v96_v40 = vpop.permute.xlu0 %95 }
  0xb2   :  { %v92_v41 = vmul.f32 %v91_v32, %v86_v39  ;;  %v102_v43 = vmul.f32 %v101_v35, %v96_v40 }
  0xb3   :  { %v83_v42 = vadd.f32 %v82_v37, %v73_v38 }
  0xb5   :  { %v93_v46 = vadd.f32 %v92_v41, %v83_v42 }
  0xb6   :  { %v106_v47 = vpop.permute.xlu1 %105  ;;  %v126_v54 = vpop.permute.xlu0 %125 }
  0xb7   :  { %v103_v49 = vadd.f32 %v102_v43, %v93_v46  ;;  %v112_v50 = vmul.f32 %v111_v44, %v106_v47  ;;  %v132_v58 = vmul.f32 %v131_v52, %v126_v54 }
  0xb9   :  { %v113_v55 = vadd.f32 %v112_v50, %v103_v49 }
  0xbb   :  { %v116_v53 = vpop.permute.xlu1 %115  ;;  %v156_v1 = vpop.permute.xlu0 %155 }
  0xbc   :  { %v122_v56 = vmul.f32 %v121_v51, %v116_v53  ;;  %v162_v5 = vmul.f32 %v161_v0, %v156_v1 }
  0xbe   :  { %v123_v57 = vadd.f32 %v122_v56, %v113_v55 }
  0xc0   :  { %v136_v60 = vpop.permute.xlu1 %135  ;;  %v133_v61 = vadd.f32 %v132_v58, %v123_v57 }
  0xc1   :  { %v142_v62 = vmul.f32 %v141_v59, %v136_v60 }
  0xc3   :  { %v143_v3 = vadd.f32 %v142_v62, %v133_v61 }
  0xc5   :  { %v146_v2 = vpop.permute.xlu1 %145 }
  0xc6   :  { %v152_v4 = vmul.f32 %v151_v63, %v146_v2 }
  0xc8   :  { %v153_v6 = vadd.f32 %v152_v4, %v143_v3 }
  0xca   :  { %v163_v8 = vadd.f32 %v162_v5, %v153_v6 }
  0xcc   :  { %v171_v9 = vadd.f32 %v189_v7, %v163_v8 }
  0xce   :  { %172 = vst [vmem:[#allocation7] sm:$0xf] %v171_v9 }
  0xcf   :  { %274 = shalt.err (!%p271_p6)
}
  0xd0   :  { %s275_s16 = scalar_lea.hbm %s377_s3, 64 }
  0xd1   :  { %p276_p7 = scmp.ne.s32.totalorder %s377_s3, %s275_s16  ;;  %p279_p8 = scmp.lt.u32.totalorder %s275_s16, %s377_s3 }
  0xd3   :  { %p281_p9 = pnand %p279_p8, %p276_p7 }
  0xd5   :  { %284 = shalt.err (!%p281_p9)
}
  0xd6   :  { %182 = dma.vmem_to_hbm [thread:$0]  %s180_s12, 64, %s377_s3, [#allocation4]  }
  0xd7   :  { %289 = dma.done.wait [#allocation4], 64  }
  0xd8   :  { %290 = vsyncadd [#allocation4], 4294967232 }
  0xd9   :  { %186 = vsyncpa [#allocation3], 1 }
  0xda   :  { %187 = vsyncpa [#allocation6], 1 }
  0xdb   :  { %188 = vsyncpa [#allocation4], 1 }

</bundles_post_ra>
